<compile_context>
chip_gen: v7x
topology: tpu7x:2x2x1
jax: 0.10.0
libtpu: 0.0.40
codegen_flags: <defaults>
</compile_context>

<pallas_src>
import jax
import jax.numpy as jnp
from jax.experimental import pallas as pl
from jax.experimental.pallas import tpu as pltpu


def _mlp_logsoftmax_kernel(x_ref, w1_ref, b1_ref, w2_ref, b2_ref, o_ref):
    # x_ref:  (D, TB)   -- native (input_size, batch) layout, batch on lanes
    # w1_ref: (Hp, D)   b1_ref: (Hp, 1)   (Hp = hidden 111 padded to 128)
    # w2_ref: (C, Hp)   b2_ref: (C, 1)    (kept f32; tiny)
    # o_ref:  (C, TB)   -- log-softmax over the class axis (axis 0)
    x = x_ref[...]

    # Linear(input_size, 111) + ReLU, batch stays on the 128-lane axis.
    h = jnp.dot(w1_ref[...], x, preferred_element_type=jnp.float32) + b1_ref[...]
    h = jnp.maximum(h, 0.0)

    # Linear(111, 2); padded hidden columns of W2 are zero, so exact.
    logits = jnp.dot(w2_ref[...], h, preferred_element_type=jnp.float32) + b2_ref[...]

    # LogSoftmax over the class axis (2 sublanes), numerically stable.
    m = jnp.max(logits, axis=0, keepdims=True)
    lse = jnp.log(jnp.sum(jnp.exp(logits - m), axis=0, keepdims=True)) + m
    o_ref[...] = logits - lse


def prepare_params(w1, b1, w2, b2, matmul_dtype=jnp.bfloat16):
    """One-time prep of PyTorch-layout params (out, in) -> kernel layout.

    Returns (w1_hd, b1_p, w2_ch, b2_p):
      w1_hd: (Hp, D)  in `matmul_dtype` (bf16 by default -> bf16 MXU, half HBM)
      b1_p:  (Hp, 1)  f32
      w2_ch: (C, Hp)  f32 (tiny; kept f32 so bias/softmax math stays exact)
      b2_p:  (C, 1)   f32
    Hidden dim is zero-padded 111 -> multiple of 128. Call once at model
    creation, not per forward.
    """
    H, D = w1.shape            # (111, input_size)
    C = w2.shape[0]            # 2
    Hp = ((H + 127) // 128) * 128

    w1_hd = jnp.zeros((Hp, D), matmul_dtype).at[:H, :].set(w1.astype(matmul_dtype))
    b1_p = jnp.zeros((Hp, 1), jnp.float32).at[:H, 0].set(b1.astype(jnp.float32))
    w2_ch = jnp.zeros((C, Hp), jnp.float32).at[:, :H].set(w2.astype(jnp.float32))
    b2_p = b2.reshape(C, 1).astype(jnp.float32)
    return w1_hd, b1_p, w2_ch, b2_p


def _round_up(v, m):
    return ((v + m - 1) // m) * m


def _choose_tb(B, D, Hp, C, x_itemsize, block_b):
    """Pick the batch tile (lane dim) from static shapes."""
    if B <= 1024:
        # Full-extent block is always legal; tiny batches are launch-bound.
        return B
    # VMEM budget ~12 MiB: x double-buffered + (Hp, TB) f32 hidden temp +
    # (C, TB) f32 output double-buffered.  Safe under v5e's 16 MiB scoped
    # default and far under v6e (32 MiB default) / v7x (64 MiB physical).
    budget = 12 * 1024 * 1024
    bytes_per_col = 2 * D * x_itemsize + Hp * 4 + 2 * C * 4
    vmem_cap = max(512, (budget // bytes_per_col) // 512 * 512)
    # Keep >= 8 grid steps so dimension_semantics=("parallel",) can shard the
    # batch axis across v7x's 2 TensorCores and the pipeline has depth.
    steps_cap = max(512, _round_up(-(-B // 8), 512))
    return min(block_b, vmem_cap, steps_cap)


def neural_net_forward(x, w1_hd, b1_p, w2_ch, b2_p, *, block_b=4096):
    """Forward pass.  x: (input_size, batch) in the same dtype as w1_hd
    (cast at the producer for the bf16 path).  Returns (batch, 2) log-probs.
    Params must come from prepare_params.
    """
    D, B = x.shape
    Hp = w1_hd.shape[0]
    C = w2_ch.shape[0]

    TB = _choose_tb(B, D, Hp, C, jnp.dtype(x.dtype).itemsize, block_b)
    grid = (pl.cdiv(B, TB),)

    cost = pl.CostEstimate(
        flops=int(2 * B * (D * Hp + Hp * C)),
        transcendentals=int(B * C),
        bytes_accessed=int(B * D * jnp.dtype(x.dtype).itemsize
                           + Hp * D * jnp.dtype(w1_hd.dtype).itemsize
                           + 4 * (Hp + C * Hp + C + C * B)),
    )

    out_cb = pl.pallas_call(
        _mlp_logsoftmax_kernel,
        out_shape=jax.ShapeDtypeStruct((C, B), jnp.float32),
        grid=grid,
        in_specs=[
            pl.BlockSpec((D, TB), lambda i: (0, i)),   # x tile walks the batch
            pl.BlockSpec((Hp, D), lambda i: (0, 0)),   # W1 resident in VMEM
            pl.BlockSpec((Hp, 1), lambda i: (0, 0)),   # b1 resident
            pl.BlockSpec((C, Hp), lambda i: (0, 0)),   # W2 resident
            pl.BlockSpec((C, 1), lambda i: (0, 0)),    # b2 resident
        ],
        out_specs=pl.BlockSpec((C, TB), lambda i: (0, i)),  # lane-dense stores
        compiler_params=pltpu.CompilerParams(
            dimension_semantics=("parallel",)),
        cost_estimate=cost,
    )(x, w1_hd, b1_p, w2_ch, b2_p)

    # Tiny (2, B) -> (B, 2) transpose to match the module's output layout.
    return out_cb.T


def _reference_forward(x, w1, b1, w2, b2):
    x_t = jnp.transpose(x, (1, 0))
    h = jnp.maximum(x_t @ w1.T + b1, 0.0)
    logits = h @ w2.T + b2
    return jax.nn.log_softmax(logits, axis=1)


if __name__ == "__main__":
    input_size = 32   # D
    batch = 8         # B
    hidden = 111
    classes = 2

    key = jax.random.PRNGKey(0)
    kx, kw1, kb1, kw2, kb2 = jax.random.split(key, 5)

    # Deterministic synthetic params in PyTorch Linear layout (out, in).
    x = jax.random.normal(kx, (input_size, batch), dtype=jnp.float32)
    w1 = jax.random.normal(kw1, (hidden, input_size), dtype=jnp.float32) * 0.1
    b1 = jax.random.normal(kb1, (hidden,), dtype=jnp.float32) * 0.1
    w2 = jax.random.normal(kw2, (classes, hidden), dtype=jnp.float32) * 0.1
    b2 = jax.random.normal(kb2, (classes,), dtype=jnp.float32) * 0.1

    ref = _reference_forward(x, w1, b1, w2, b2)

    # Exact f32 path.
    p32 = prepare_params(w1, b1, w2, b2, matmul_dtype=jnp.float32)
    out32 = jax.block_until_ready(neural_net_forward(x, *p32))
    assert out32.shape == (batch, classes)
    assert jnp.allclose(out32, ref, atol=1e-4, rtol=1e-4), "f32 mismatch vs reference"

    # bf16 matmul path (x cast once at the producer, not per-call).
    pbf = prepare_params(w1, b1, w2, b2, matmul_dtype=jnp.bfloat16)
    x_bf = x.astype(jnp.bfloat16)
    out_bf = jax.block_until_ready(neural_net_forward(x_bf, *pbf))
    assert out_bf.shape == (batch, classes)
    assert jnp.allclose(out_bf, ref, atol=5e-2, rtol=5e-2), "bf16 mismatch vs reference"

    print("KERNEL_OK")
</pallas_src>

<mosaic_0001>
module attributes {stable_mosaic.version = 11 : i64} {
  func.func @_mlp_logsoftmax_kernel(%arg0: i32, %arg1: memref<32x8xf32, #tpu.memory_space<vmem>>, %arg2: memref<128x32xf32, #tpu.memory_space<vmem>>, %arg3: memref<128x1xf32, #tpu.memory_space<vmem>>, %arg4: memref<2x128xf32, #tpu.memory_space<vmem>>, %arg5: memref<2x1xf32, #tpu.memory_space<vmem>>, %arg6: memref<2x8xf32, #tpu.memory_space<vmem>>) attributes {dimension_semantics = [#tpu.dimension_semantics<parallel>], iteration_bounds = array<i64: 1>, scalar_prefetch = 0 : i64, scratch_operands = 0 : i64, tpu.core_type = #tpu.core_type<tc>, window_params = [{transform_indices = @transform_0, window_bounds = array<i64: 32, 8>}, {pipeline_mode = #tpu.pipeline_mode<synchronous>, transform_indices = @transform_1, window_bounds = array<i64: 128, 32>}, {pipeline_mode = #tpu.pipeline_mode<synchronous>, transform_indices = @transform_2, window_bounds = array<i64: 128, 1>}, {pipeline_mode = #tpu.pipeline_mode<synchronous>, transform_indices = @transform_3, window_bounds = array<i64: 2, 128>}, {pipeline_mode = #tpu.pipeline_mode<synchronous>, transform_indices = @transform_4, window_bounds = array<i64: 2, 1>}, {transform_indices = @transform_5, window_bounds = array<i64: 2, 8>}]} {
    %c0 = arith.constant 0 : index
    %c0_0 = arith.constant 0 : index
    %0 = vector.load %arg1[%c0, %c0_0] : memref<32x8xf32, #tpu.memory_space<vmem>>, vector<32x8xf32>
    %c0_1 = arith.constant 0 : index
    %c0_2 = arith.constant 0 : index
    %1 = vector.load %arg2[%c0_1, %c0_2] : memref<128x32xf32, #tpu.memory_space<vmem>>, vector<128x32xf32>
    %cst = arith.constant dense<0.000000e+00> : vector<128x8xf32>
    %2 = tpu.matmul %1, %0, %cst {dimension_numbers = #tpu.dot_dimension_numbers<[1], [0], [0], [1], [0, 0, 1, 1], [], []>} : vector<128x32xf32>, vector<32x8xf32>, vector<128x8xf32> -> vector<128x8xf32>
    %c0_3 = arith.constant 0 : index
    %c0_4 = arith.constant 0 : index
    %3 = vector.load %arg3[%c0_3, %c0_4] : memref<128x1xf32, #tpu.memory_space<vmem>>, vector<128x1xf32>
    %4 = vector.broadcast %3 : vector<128x1xf32> to vector<128x8xf32>
    %5 = arith.addf %2, %4 : vector<128x8xf32>
    %cst_5 = arith.constant 0.000000e+00 : f32
    %6 = vector.broadcast %cst_5 : f32 to vector<128x8xf32>
    %7 = arith.maximumf %5, %6 : vector<128x8xf32>
    %c0_6 = arith.constant 0 : index
    %c0_7 = arith.constant 0 : index
    %8 = vector.load %arg4[%c0_6, %c0_7] : memref<2x128xf32, #tpu.memory_space<vmem>>, vector<2x128xf32>
    %cst_8 = arith.constant dense<0.000000e+00> : vector<2x8xf32>
    %9 = tpu.matmul %8, %7, %cst_8 {dimension_numbers = #tpu.dot_dimension_numbers<[1], [0], [0], [1], [0, 0, 1, 1], [], []>} : vector<2x128xf32>, vector<128x8xf32>, vector<2x8xf32> -> vector<2x8xf32>
    %c0_9 = arith.constant 0 : index
    %c0_10 = arith.constant 0 : index
    %10 = vector.load %arg5[%c0_9, %c0_10] : memref<2x1xf32, #tpu.memory_space<vmem>>, vector<2x1xf32>
    %11 = vector.broadcast %10 : vector<2x1xf32> to vector<2x8xf32>
    %12 = arith.addf %9, %11 : vector<2x8xf32>
    %cst_11 = arith.constant dense<0xFF800000> : vector<8xf32>
    %13 = vector.multi_reduction <maximumf>, %12, %cst_11 [0] : vector<2x8xf32> to vector<8xf32>
    %14 = vector.shape_cast %13 : vector<8xf32> to vector<1x8xf32>
    %15 = vector.broadcast %14 : vector<1x8xf32> to vector<2x8xf32>
    %16 = arith.subf %12, %15 : vector<2x8xf32>
    %17 = math.exp %16 : vector<2x8xf32>
    %cst_12 = arith.constant dense<0.000000e+00> : vector<8xf32>
    %18 = vector.multi_reduction <add>, %17, %cst_12 [0] : vector<2x8xf32> to vector<8xf32>
    %19 = vector.shape_cast %18 : vector<8xf32> to vector<1x8xf32>
    %20 = math.log %19 : vector<1x8xf32>
    %21 = arith.addf %20, %14 : vector<1x8xf32>
    %22 = vector.broadcast %21 : vector<1x8xf32> to vector<2x8xf32>
    %23 = arith.subf %12, %22 : vector<2x8xf32>
    %c0_13 = arith.constant 0 : index
    %c0_14 = arith.constant 0 : index
    %24 = vector.load %arg6[%c0_13, %c0_14] : memref<2x8xf32, #tpu.memory_space<vmem>>, vector<2x8xf32>
    tpu.vector_store %arg6[%c0_13, %c0_14], %23 {strides = array<i32>} : memref<2x8xf32, #tpu.memory_space<vmem>>, vector<2x8xf32>,
    return
  }
  func.func @transform_0(%arg0: i32) -> (i32, i32) {
    %c0_i32 = arith.constant 0 : i32
    %c0_i32_0 = arith.constant 0 : i32
    return %c0_i32, %arg0 : i32, i32
  }
  func.func @transform_1(%arg0: i32) -> (i32, i32) {
    %c0_i32 = arith.constant 0 : i32
    %c0_i32_0 = arith.constant 0 : i32
    %c0_i32_1 = arith.constant 0 : i32
    return %c0_i32, %c0_i32_0 : i32, i32
  }
  func.func @transform_2(%arg0: i32) -> (i32, i32) {
    %c0_i32 = arith.constant 0 : i32
    %c0_i32_0 = arith.constant 0 : i32
    %c0_i32_1 = arith.constant 0 : i32
    return %c0_i32, %c0_i32_0 : i32, i32
  }
  func.func @transform_3(%arg0: i32) -> (i32, i32) {
    %c0_i32 = arith.constant 0 : i32
    %c0_i32_0 = arith.constant 0 : i32
    %c0_i32_1 = arith.constant 0 : i32
    return %c0_i32, %c0_i32_0 : i32, i32
  }
  func.func @transform_4(%arg0: i32) -> (i32, i32) {
    %c0_i32 = arith.constant 0 : i32
    %c0_i32_0 = arith.constant 0 : i32
    %c0_i32_1 = arith.constant 0 : i32
    return %c0_i32, %c0_i32_0 : i32, i32
  }
  func.func @transform_5(%arg0: i32) -> (i32, i32) {
    %c0_i32 = arith.constant 0 : i32
    %c0_i32_0 = arith.constant 0 : i32
    return %c0_i32, %arg0 : i32, i32
  }
}

</mosaic_0001>

<bundles_post_ra>
// kernel: tpu_custom_call.1
= control target key start
LH: loop header
LB: loop body
LE: loop exit
PB: predicated region body
PF: predicated region fallthrough
CT: control target
= control target key end

     0   :  { %vm137_vm0 = vcmask 261120   ;;  %v648_v6 = vmov 0   ;;  %s836_s0 = inlined_call_operand.vmem [shape: f32[32,8], index: 0, kind: input, shape index: {}]   ;;  %s837_s1 = inlined_call_operand.vmem [shape: f32[128,32], index: 1, kind: input, shape index: {}]   ;;  %s838_s2 = inlined_call_operand.vmem [shape: f32[128,1], index: 2, kind: input, shape index: {}]   ;;  %s839_s3 = inlined_call_operand.vmem [shape: f32[2,128], index: 3, kind: input, shape index: {}]   ;;  %s840_s4 = inlined_call_operand.vmem [shape: f32[2,1], index: 4, kind: input, shape index: {}]   ;;  %s841_s5 = inlined_call_operand.hbm [shape: f32[2,8], index: 5, kind: output, shape index: {}]  }
   0x1   :  { %v21_v0 = vld [vmem:[%s836_s0] sm:$0xff]  ;;  %v22_v1 = vld [vmem:[%s836_s0 + $0x8] sm:$0xff]  ;;  %v23_v2 = vld [vmem:[%s836_s0 + $0x10] sm:$0xff]  ;;  %618 = vset.pattern.permute.xlu0 %v648_v6  ;;  %619 = vset.pattern.permute.xlu1 %v648_v6 }
   0x2   :  { %v581_v3 = vpack.c.bf16 %v22_v1, %v21_v0  ;;  %v24_v4 = vld [vmem:[%s836_s0 + $0x18] sm:$0xff]  ;;  %v25_v5 = vld [vmem:[%s837_s1] sm:$0xff]  ;;  %v43_v9 = vld [vmem:[%s838_s2 + $0x10] sm:$0xff] }
   0x3   :  { %v585_v7 = vpack.c.bf16 %v24_v4, %v23_v2  ;;  %522 = vmatprep.mubr.msk.f32.mxu0 %vm137_vm0, %v25_v5  ;;  %v41_v8 = vld [vmem:[%s838_s2] sm:$0xff]  ;;  %v26_v10 = vld [vmem:[%s837_s1 + $0x8] sm:$0xff]  ;;  %69 = vperm.xlu1 %619, %v43_v9   ;;  %v27_v12 = vld [vmem:[%s837_s1 + $0x10] sm:$0xff] }
   0x4   :  { %582 = vmatprep.subr.bf16.mxu0 %v581_v3  ;;  %59 = vperm.xlu0 %618, %v41_v8   ;;  %v42_v11 = vld [vmem:[%s838_s2 + $0x8] sm:$0xff]  ;;  %v44_v13 = vld [vmem:[%s838_s2 + $0x18] sm:$0xff]  ;;  %v45_v15 = vld [vmem:[%s838_s2 + $0x20] sm:$0xff] }
   0x5   :  { %584 = vmatpush3.bf16.msra.mxu0 %v581_v3  ;;  %v28_v14 = vld [vmem:[%s837_s1 + $0x18] sm:$0xff] }
   0x6   :  { %586 = vmatprep.subr.bf16.mxu0 %v585_v7 }
   0x7   :  { %74 = vperm.xlu1 %619, %v44_v13  }
   0x8   :  { %64 = vperm.xlu0 %618, %v42_v11  }
   0x9   :  { %588 = vmatpush3.bf16.msra.mxu0 %v585_v7 }
   0xc   :  { %523 = vmatmul.mubr.msk.f32.vlgmr.msra.gmra.mrb[0].mxu0 %vm137_vm0, %v26_v10 }
   0xd   :  { %525 = vmatprep.mubr.msk.f32.mxu0 %vm137_vm0, %v27_v12 }
   0xe   :  { %10 = vsyncpa [#allocation3], 0  ;;  %v29_v16 = vld [vmem:[%s837_s1 + $0x20] sm:$0xff]  ;;  %v46_v17 = vld [vmem:[%s838_s2 + $0x28] sm:$0xff]  ;;  %79 = vperm.xlu0 %618, %v45_v15   ;;  %v649_v40 = vmov 0.0|0.0   ;;  %vm650_vm1 = vmmov 0  }
   0xf   :  { %v30_v18 = vld [vmem:[%s837_s1 + $0x28] sm:$0xff]  ;;  %v47_v19 = vld [vmem:[%s838_s2 + $0x30] sm:$0xff]  ;;  %84 = vperm.xlu1 %619, %v46_v17   ;;  %v48_v21 = vld [vmem:[%s838_s2 + $0x38] sm:$0xff]  ;;  %589 = vmatprep.subr.bf16.mxu1 %v649_v40  ;;  %v651_v41 = vmov 0.0   ;;  %vm424_vm2 = vcmask 58368  }
  0x10   :  { %526 = vmatmul.mubr.msk.f32.gmra.mrb[2].mxu0 %vm137_vm0, %v28_v14  ;;  %v31_v20 = vld [vmem:[%s837_s1 + $0x30] sm:$0xff]  ;;  %v32_v22 = vld [vmem:[%s837_s1 + $0x38] sm:$0xff]  ;;  %v49_v23 = vld [vmem:[%s838_s2 + $0x40] sm:$0xff]  ;;  %578 = vmatprep.mubr.msk.f32.mxu1 %vm650_vm1, %v651_v41 }
  0x11   :  { %528 = vmatprep.mubr.msk.f32.mxu0 %vm137_vm0, %v29_v16  ;;  %v33_v24 = vld [vmem:[%s837_s1 + $0x40] sm:$0xff]  ;;  %v50_v25 = vld [vmem:[%s838_s2 + $0x48] sm:$0xff]  ;;  %v51_v27 = vld [vmem:[%s838_s2 + $0x50] sm:$0xff] }
  0x12   :  { %89 = vperm.xlu0 %618, %v47_v19   ;;  %v34_v26 = vld [vmem:[%s837_s1 + $0x48] sm:$0xff]  ;;  %v35_v28 = vld [vmem:[%s837_s1 + $0x50] sm:$0xff]  ;;  %v52_v29 = vld [vmem:[%s838_s2 + $0x58] sm:$0xff] }
  0x13   :  { %94 = vperm.xlu1 %619, %v48_v21   ;;  %v36_v30 = vld [vmem:[%s837_s1 + $0x58] sm:$0xff]  ;;  %v53_v31 = vld [vmem:[%s838_s2 + $0x60] sm:$0xff]  ;;  %v54_v33 = vld [vmem:[%s838_s2 + $0x68] sm:$0xff] }
  0x14   :  { %529 = vmatmul.mubr.msk.f32.gmra.mrb[4].mxu0 %vm137_vm0, %v30_v18  ;;  %v37_v32 = vld [vmem:[%s837_s1 + $0x60] sm:$0xff]  ;;  %v38_v34 = vld [vmem:[%s837_s1 + $0x68] sm:$0xff]  ;;  %v55_v35 = vld [vmem:[%s838_s2 + $0x70] sm:$0xff] }
  0x15   :  { %531 = vmatprep.mubr.msk.f32.mxu0 %vm137_vm0, %v31_v20  ;;  %v39_v36 = vld [vmem:[%s837_s1 + $0x70] sm:$0xff]  ;;  %v56_v37 = vld [vmem:[%s838_s2 + $0x78] sm:$0xff]  ;;  %v348_v39 = vld [vmem:[%s840_s4] sm:$0x3] }
  0x16   :  { %99 = vperm.xlu0 %618, %v49_v23   ;;  %v40_v38 = vld [vmem:[%s837_s1 + $0x78] sm:$0xff] }
  0x17   :  { %104 = vperm.xlu1 %619, %v50_v25  }
  0x18   :  { %532 = vmatmul.mubr.msk.f32.gmra.mrb[6].mxu0 %vm137_vm0, %v32_v22 }
  0x19   :  { %534 = vmatprep.mubr.msk.f32.mxu0 %vm137_vm0, %v33_v24 }
  0x1a   :  { %109 = vperm.xlu0 %618, %v51_v27  }
  0x1b   :  { %114 = vperm.xlu1 %619, %v52_v29  }
  0x1c   :  { %535 = vmatmul.mubr.msk.f32.gmra.mrb[8].mxu0 %vm137_vm0, %v34_v26 }
  0x1d   :  { %537 = vmatprep.mubr.msk.f32.mxu0 %vm137_vm0, %v35_v28 }
  0x1e   :  { %119 = vperm.xlu0 %618, %v53_v31  }
  0x1f   :  { %124 = vperm.xlu1 %619, %v54_v33  }
  0x20   :  { %538 = vmatmul.mubr.msk.f32.gmra.mrb[10].mxu0 %vm137_vm0, %v36_v30 }
  0x21   :  { %540 = vmatprep.mubr.msk.f32.mxu0 %vm137_vm0, %v37_v32 }
  0x22   :  { %129 = vperm.xlu0 %618, %v55_v35  }
  0x23   :  { %134 = vperm.xlu1 %619, %v56_v37  }
  0x24   :  { %541 = vmatmul.mubr.msk.f32.gmra.mrb[12].mxu0 %vm137_vm0, %v38_v34 }
  0x25   :  { %543 = vmatprep.mubr.msk.f32.mxu0 %vm137_vm0, %v39_v36 }
  0x26   :  { %351 = vperm.xlu0 %618, %v348_v39  }
  0x28   :  { %544 = vmatmul.mubr.msk.f32.gmra.mrb[14].mxu0 %vm137_vm0, %v40_v38 }
  0x82   :  { %v70_v42 = vpop.permute.xlu1 %69 }
  0x83   :  { %v60_v43 = vpop.permute.xlu0 %59 }
  0x86   :  { %v75_v44 = vpop.permute.xlu1 %74 }
  0x87   :  { %v65_v45 = vpop.permute.xlu0 %64 }
  0x8d   :  { %v80_v47 = vpop.permute.xlu0 %79 }
  0x8e   :  { %v85_v46 = vpop.permute.xlu1 %84 }
  0x91   :  { %v90_v56 = vpop.permute.xlu0 %89 }
  0x92   :  { %v95_v53 = vpop.permute.xlu1 %94 }
  0x95   :  { %v100_v5 = vpop.permute.xlu0 %99 }
  0x96   :  { %v105_v2 = vpop.permute.xlu1 %104 }
  0x99   :  { %v110_v17 = vpop.permute.xlu0 %109 }
  0x9a   :  { %v115_v14 = vpop.permute.xlu1 %114 }
  0x9d   :  { %v120_v30 = vpop.permute.xlu0 %119 }
  0x9e   :  { %v125_v27 = vpop.permute.xlu1 %124 }
  0xa2   :  { %v135_v39 = vpop.permute.xlu1 %134 }
  0xdf   :  { %v524_v48 = vpop.f32.mrb[0].mxu0 }
  0xe0   :  { %v258_v49 = vadd.f32 %v524_v48, %v65_v45  ;;  %v252_v50 = vpop.f32.mrb[1].mxu0 }
  0xe1   :  { %v253_v51 = vadd.f32 %v252_v50, %v60_v43  ;;  %v130_v43 = vpop.permute.xlu0 %129 }
  0xe2   :  { %v332_v52 = vmax.f32 %v258_v49, 0.0 }
  0xe3   :  { %v331_v54 = vmax.f32 %v253_v51, 0.0  ;;  %v527_v55 = vpop.f32.mrb[2].mxu0  ;;  %v347_v51 = vld [vmem:[%s839_s3] sm:$0x3]  ;;  %s652_s3 = smov [#allocation2]  }
  0xe4   :  { %v268_v57 = vadd.f32 %v527_v55, %v75_v44  ;;  %v262_v58 = vpop.f32.mrb[3].mxu0  ;;  %s453_s4 = sshll.u32 %s652_s3, 4  ;;  %s454_s4 = int_to_ptr.vmem [resolvable:$true] %s453_s4 }
  0xe5   :  { %v263_v59 = vadd.f32 %v262_v58, %v70_v42  ;;  %v590_v60 = vpack.c.bf16 %v332_v52, %v331_v54  ;;  %v352_v52 = vpop.permute.xlu0 %351  ;;  %s624_s14 = scalar_lea.vmem %s454_s4, 32  ;;  %p629_p1 = scmp.lt.s32.totalorder %s454_s4, %s454_s4 }
  0xe6   :  { %v334_v61 = vmax.f32 %v268_v57, 0.0  ;;  %p625_p0 = scmp.ne.s32.totalorder %s454_s4, %s624_s14  ;;  %p630_p2 = scmp.lt.s32.totalorder %s624_s14, %s624_s14 }
  0xe7   :  { %v333_v62 = vmax.f32 %v263_v59, 0.0  ;;  %v530_v63 = vpop.f32.mrb[4].mxu0  ;;  %591 = vmatpush3.bf16.msra.mxu1 %v590_v60 }
  0xe8   :  { %v278_v0 = vadd.f32 %v530_v63, %v85_v46  ;;  %v272_v1 = vpop.f32.mrb[5].mxu0  ;;  %592 = vmatprep.subr.bf16.mxu1 %v649_v40  ;;  %p631_p3 = por %p630_p2, %p629_p1 }
  0xe9   :  { %v593_v3 = vpack.c.bf16 %v334_v61, %v333_v62  ;;  %v273_v4 = vadd.f32 %v272_v1, %v80_v47 }
  0xea   :  { %v336_v6 = vmax.f32 %v278_v0, 0.0  ;;  %p632_p4 = pnand %p631_p3, %p625_p0 }
  0xeb   :  { %v335_v7 = vmax.f32 %v273_v4, 0.0  ;;  %v533_v8 = vpop.f32.mrb[6].mxu0  ;;  %594 = vmatpush3.bf16.msra.mxu1 %v593_v3 }
  0xec   :  { %v288_v9 = vadd.f32 %v533_v8, %v95_v53  ;;  %v282_v10 = vpop.f32.mrb[7].mxu0  ;;  %595 = vmatprep.subr.bf16.mxu1 %v649_v40 }
  0xed   :  { %v596_v11 = vpack.c.bf16 %v336_v6, %v335_v7  ;;  %v283_v12 = vadd.f32 %v282_v10, %v90_v56 }
  0xee   :  { %v338_v13 = vmax.f32 %v288_v9, 0.0 }
  0xef   :  { %v337_v15 = vmax.f32 %v283_v12, 0.0  ;;  %v536_v16 = vpop.f32.mrb[8].mxu0  ;;  %597 = vmatpush3.bf16.msra.mxu1 %v596_v11 }
  0xf0   :  { %v298_v18 = vadd.f32 %v536_v16, %v105_v2  ;;  %v292_v19 = vpop.f32.mrb[9].mxu0  ;;  %598 = vmatprep.subr.bf16.mxu1 %v649_v40 }
  0xf1   :  { %v599_v20 = vpack.c.bf16 %v338_v13, %v337_v15  ;;  %v293_v21 = vadd.f32 %v292_v19, %v100_v5 }
  0xf2   :  { %v340_v22 = vmax.f32 %v298_v18, 0.0 }
  0xf3   :  { %v339_v23 = vmax.f32 %v293_v21, 0.0  ;;  %v539_v24 = vpop.f32.mrb[10].mxu0  ;;  %600 = vmatpush3.bf16.msra.mxu1 %v599_v20 }
  0xf4   :  { %v308_v25 = vadd.f32 %v539_v24, %v115_v14  ;;  %v302_v26 = vpop.f32.mrb[11].mxu0  ;;  %601 = vmatprep.subr.bf16.mxu1 %v649_v40 }
  0xf5   :  { %v602_v28 = vpack.c.bf16 %v340_v22, %v339_v23  ;;  %v303_v29 = vadd.f32 %v302_v26, %v110_v17 }
  0xf6   :  { %v342_v31 = vmax.f32 %v308_v25, 0.0 }
  0xf7   :  { %v341_v32 = vmax.f32 %v303_v29, 0.0  ;;  %v542_v33 = vpop.f32.mrb[12].mxu0  ;;  %603 = vmatpush3.bf16.msra.mxu1 %v602_v28 }
  0xf8   :  { %v318_v34 = vadd.f32 %v542_v33, %v125_v27  ;;  %v312_v35 = vpop.f32.mrb[13].mxu0  ;;  %604 = vmatprep.subr.bf16.mxu1 %v649_v40 }
  0xf9   :  { %v605_v36 = vpack.c.bf16 %v342_v31, %v341_v32  ;;  %v313_v37 = vadd.f32 %v312_v35, %v120_v30 }
  0xfa   :  { %v344_v38 = vmax.f32 %v318_v34, 0.0 }
  0xfb   :  { %v343_v41 = vmax.f32 %v313_v37, 0.0  ;;  %v545_v42 = vpop.f32.mrb[14].mxu0  ;;  %606 = vmatpush3.bf16.msra.mxu1 %v605_v36 }
  0xfc   :  { %v328_v44 = vadd.f32 %v545_v42, %v135_v39  ;;  %v322_v45 = vpop.f32.mrb[15].mxu0  ;;  %607 = vmatprep.subr.bf16.mxu1 %v649_v40 }
  0xfd   :  { %v608_v46 = vpack.c.bf16 %v344_v38, %v343_v41  ;;  %v323_v47 = vadd.f32 %v322_v45, %v130_v43 }
  0xfe   :  { %v346_v48 = vmax.f32 %v328_v44, 0.0 }
  0xff   :  { %v345_v49 = vmax.f32 %v323_v47, 0.0  ;;  %609 = vmatpush3.bf16.msra.mxu1 %v608_v46 }
 0x100   :  { %610 = vmatprep.subr.bf16.mxu1 %v649_v40 }
 0x101   :  { %v611_v50 = vpack.c.bf16 %v346_v48, %v345_v49 }
 0x103   :  { %612 = vmatpush3.bf16.msra.mxu1 %v611_v50 }
 0x106   :  { %579 = vmatmul.mubr.f32.vlgmr.msra.gmra.mrb[0].mxu1 %v347_v51 }
 0x1d9   :  { %v420_v53 = vpop.f32.mrb[0].mxu1 }
 0x1da   :  { %v421_v54 = vadd.f32 %v420_v53, %v352_v52  ;;  %v580_v55 = vpop.f32.mrb[1].mxu1 }
 0x1dc   :  { %v425_v56 = vsel %vm424_vm2, %v421_v54, -inf }
 0x1dd   :  { %v426_v57 = vrot.slane %v425_v56, 4 }
 0x1df   :  { %v427_v58 = vmax.f32 %v425_v56, %v426_v57 }
 0x1e1   :  { %v428_v59 = vrot.slane %v427_v58, 2 }
 0x1e3   :  { %v429_v60 = vmax.f32 %v427_v58, %v428_v59 }
 0x1e5   :  { %v430_v61 = vrot.slane %v429_v60, 1 }
 0x1e7   :  { %v431_v40 = vmax.f32 %v429_v60, %v430_v61 }
 0x1e9   :  { %v432_v62 = vsub.f32 %v421_v54, %v431_v40 }
 0x1eb   :  { %v433_v63 = vmul.f32 1.442695, %v432_v62 }
 0x1ed   :  { %620 = vpow2.f32 %v433_v63 }
 0x1f7   :  { %v621_v0 = vpop.eup %620 }
 0x1f8   :  { %v435_v1 = vsel %vm424_vm2, %v621_v0, 0.0 }
 0x1f9   :  { %v436_v2 = vrot.slane %v435_v1, 4 }
 0x1fb   :  { %v437_v3 = vadd.f32 %v436_v2, %v435_v1 }
 0x1fd   :  { %v438_v4 = vrot.slane %v437_v3, 2 }
 0x1ff   :  { %v439_v5 = vadd.f32 %v438_v4, %v437_v3 }
 0x201   :  { %v440_v6 = vrot.slane %v439_v5, 1 }
 0x203   :  { %v441_v7 = vadd.f32 %v440_v6, %v439_v5 }
 0x205   :  { %622 = vlog2.f32 %v441_v7 }
 0x20f   :  { %v623_v8 = vpop.eup %622 }
 0x210   :  { %v443_v9 = vmul.f32 0.6931472, %v623_v8 }
 0x212   :  { %v444_v10 = vadd.f32 %v443_v9, %v431_v40 }
 0x214   :  { %v445_v11 = vsub.f32 %v421_v54, %v444_v10 }
 0x216   :  { %446 = vst.msk [vmem:[#allocation2] sm:$0x3] %vm424_vm2, %v445_v11 }
 0x217   :  { %635 = shalt.err (!%p632_p4)
}
 0x218   :  { %s636_s17 = scalar_lea.hbm %s841_s5, 32 }
 0x219   :  { %p637_p5 = scmp.ne.s32.totalorder %s841_s5, %s636_s17  ;;  %p640_p6 = scmp.lt.u32.totalorder %s636_s17, %s841_s5 }
 0x21b   :  { %p642_p7 = pnand %p640_p6, %p637_p5 }
 0x21d   :  { %645 = shalt.err (!%p642_p7)
}
 0x21e   :  { %456 = dma.vmem_to_hbm [thread:$0]  %s454_s4, 32, %s841_s5, [#allocation3]  }
 0x21f   :  { %646 = dma.done.wait [#allocation3], 32  }
 0x220   :  { %647 = vsyncadd [#allocation3], 4294967264 }
 0x221   :  { %460 = vsyncpa [#allocation3], 1 }

</bundles_post_ra>
